<compile_context>
chip_gen: v7x
topology: tpu7x:2x2x1
jax: 0.10.0
libtpu: 0.0.40
codegen_flags: <defaults>
</compile_context>

<pallas_src>
import jax
import jax.numpy as jnp
from jax import lax
from jax.experimental import pallas as pl
from jax.experimental.pallas import tpu as pltpu


def head_attention_kernel(x_ref, wqkv_ref, bqkv_ref, mask_ref, out_ref, attn_ref):
    """One grid step processes b_block batch elements.

    x_ref    : (Mblk, E)   flattened rows (Mblk = b_block * T), compute dtype
    wqkv_ref : (E, 3*Hp)   fused [Wq*scale | Wk | Wv], Hp = ceil(H/128)*128
    bqkv_ref : (1, 3*Hp)   fused bias (f32), scale folded into the Q part
    mask_ref : (T, T)      additive causal mask (0 on/below diag, -1e30 above)
    out_ref  : (Mblk, Hp)  lane-dense output slab, f32
    attn_ref : (1, T, T)   attention map of this block's LAST batch element
    """
    Mblk, _ = x_ref.shape
    Hp = out_ref.shape[-1]
    T = mask_ref.shape[0]
    Bblk = Mblk // T
    mm_dtype = x_ref.dtype          # bf16 (default) or f32; accumulation is f32

    # ---- fused QKV projection: one large-M MXU matmul, f32 accumulate --------
    qkv = jnp.dot(x_ref[...], wqkv_ref[...], preferred_element_type=jnp.float32)
    qkv = qkv + bqkv_ref[...]                         # single broadcast bias add

    # ---- lane-aligned Q/K/V split (offsets are multiples of 128) -------------
    q = qkv[:, 0 * Hp:1 * Hp]                         # scale already folded in
    k = qkv[:, 1 * Hp:2 * Hp]
    v = qkv[:, 2 * Hp:3 * Hp]
    q3 = q.astype(mm_dtype).reshape(Bblk, T, Hp)
    k3 = k.astype(mm_dtype).reshape(Bblk, T, Hp)
    v3 = v.astype(mm_dtype).reshape(Bblk, T, Hp)

    # ---- scores: contraction over the LAST dim of both operands (no k.T) -----
    scores = jnp.einsum("bqd,bkd->bqk", q3, k3,
                        preferred_element_type=jnp.float32)   # (Bblk, T, T) f32
    scores = scores + mask_ref[...][None, :, :]               # additive causal mask

    # ---- softmax over last axis (f32): EUP approx reciprocal + 1 Newton ------
    m = jnp.max(scores, axis=-1, keepdims=True)
    p = jnp.exp(scores - m)
    denom = jnp.sum(p, axis=-1, keepdims=True)
    r = pl.reciprocal(denom, approx=True)
    r = r * (2.0 - denom * r)                                 # ~exact after Newton
    attn = p * r                                              # (Bblk, T, T) f32

    # dropout: eval-mode identity
    # TODO(synk): training-mode dropout (Bernoulli mask via pltpu.prng_random_bits)

    # ---- out = attn @ v -------------------------------------------------------
    out = jnp.einsum("bqk,bkd->bqd", attn.astype(mm_dtype), v3,
                     preferred_element_type=jnp.float32)
    out_ref[...] = out.reshape(Mblk, Hp).astype(out_ref.dtype)

    # Per-block attention map, written unconditionally every grid step (so the
    # batch axis can be "parallel"); the wrapper takes [-1].
    attn_ref[...] = attn[Bblk - 1][None].astype(attn_ref.dtype)


def _choose_b_block(B, T, E, Hp, in_bytes):
    """Largest batch block whose per-step footprint fits a v7x-safe VMEM budget;
    stop growing once the fused matmul sees >= 256 rows (v6e/v7x MXU width)."""
    target_rows = 256
    budget = 32 * 1024 * 1024           # conservative; fits v7x scoped VMEM
    best = 1
    for d in range(1, B + 1):
        if B % d:
            continue
        mrows = d * T
        footprint = (2 * mrows * E * in_bytes          # x block, double-buffered
                     + E * 3 * Hp * in_bytes           # weights (Buffered(1))
                     + mrows * 3 * Hp * 4              # qkv f32
                     + 3 * mrows * Hp * in_bytes       # q/k/v casts
                     + 2 * d * T * T * 4               # scores + p (f32)
                     + 2 * mrows * Hp * 4)             # out, double-buffered
        if footprint <= budget:
            best = d
            if mrows >= target_rows:
                break
    return best


def head_attention(x, wq, bq, wk, bk, wv, bv, *,
                   compute_dtype=jnp.bfloat16, b_block=None):
    """x: (B, T, E); w*: (E, H); b*: (1, H).

    Returns (out (B, T, H) f32, attn_last (T, T) f32) matching the PyTorch
    module's (out, attention[-1]) with eval-mode dropout.
    """
    B, T, E = x.shape
    H = wq.shape[1]
    Hp = ((H + 127) // 128) * 128                     # pad head dim to 128 lanes
    scale = 1.0 / float(H) ** 0.5

    def pad_cols(a):                                   # (rows, H) -> (rows, Hp)
        return jnp.pad(a, ((0, 0), (0, Hp - H)))

    # Fused, padded, pre-scaled weights / bias (wrapper-side, one-time cost).
    wqkv = jnp.concatenate(
        [pad_cols(wq) * scale, pad_cols(wk), pad_cols(wv)], axis=1
    ).astype(compute_dtype)                            # (E, 3*Hp)
    bqkv = jnp.concatenate(
        [pad_cols(bq) * scale, pad_cols(bk), pad_cols(bv)], axis=1
    ).astype(jnp.float32)                              # (1, 3*Hp)

    # Additive causal mask (replaces per-step iota/compare/select).
    tril = jnp.tril(jnp.ones((T, T), dtype=bool))
    mask = jnp.where(tril, 0.0, -1e30).astype(jnp.float32)

    # Pre-flattened input: the kernel block is 2-D (no in-kernel merge reshape).
    x2d = x.reshape(B * T, E).astype(compute_dtype)

    in_bytes = jnp.dtype(compute_dtype).itemsize
    if b_block is None:
        b_block = _choose_b_block(B, T, E, Hp, in_bytes)
    assert B % b_block == 0, "batch must be divisible by the batch block"
    num_blocks = B // b_block
    Mblk = b_block * T
    assert (Mblk % 8 == 0) or (num_blocks == 1), \
        "row block must be a multiple of 8 sublanes (or cover the whole batch)"

    grid_spec = pltpu.PrefetchScalarGridSpec(
        num_scalar_prefetch=0,
        grid=(num_blocks,),
        in_specs=[
            pl.BlockSpec((Mblk, E), lambda b: (b, 0)),                    # x rows
            pl.BlockSpec((E, 3 * Hp), lambda b: (0, 0),
                         pipeline_mode=pl.Buffered(buffer_count=1)),      # Wqkv
            pl.BlockSpec((1, 3 * Hp), lambda b: (0, 0),
                         pipeline_mode=pl.Buffered(buffer_count=1)),      # bias
            pl.BlockSpec((T, T), lambda b: (0, 0),
                         pipeline_mode=pl.Buffered(buffer_count=1)),      # mask
        ],
        out_specs=[
            pl.BlockSpec((Mblk, Hp), lambda b: (b, 0)),                   # out slab
            pl.BlockSpec((1, T, T), lambda b: (b, 0, 0)),                 # attn/block
        ],
    )

    out2d, attn_blocks = pl.pallas_call(
        head_attention_kernel,
        grid_spec=grid_spec,
        out_shape=(
            jax.ShapeDtypeStruct((B * T, Hp), jnp.float32),
            jax.ShapeDtypeStruct((num_blocks, T, T), jnp.float32),
        ),
        compiler_params=pltpu.CompilerParams(
            dimension_semantics=("parallel",),        # per-block writes only
            vmem_limit_bytes=48 * 1024 * 1024,        # above the scoped defaults,
                                                      # with headroom on v7x
        ),
    )(x2d, wqkv, bqkv, mask)

    out = out2d[:, :H].reshape(B, T, H)               # drop lane padding (XLA)
    attn_last = attn_blocks[-1]                       # PyTorch returns attention[-1]
    return out, attn_last


def init_params(key, embed_size, hidden_size):
    """Deterministic parameter init; weights stored as (E, H) = W^T."""
    ks = jax.random.split(key, 6)
    bound = 1.0 / jnp.sqrt(jnp.float32(embed_size))
    wq = jax.random.uniform(ks[0], (embed_size, hidden_size), jnp.float32, -bound, bound)
    bq = jax.random.uniform(ks[1], (1, hidden_size), jnp.float32, -bound, bound)
    wk = jax.random.uniform(ks[2], (embed_size, hidden_size), jnp.float32, -bound, bound)
    bk = jax.random.uniform(ks[3], (1, hidden_size), jnp.float32, -bound, bound)
    wv = jax.random.uniform(ks[4], (embed_size, hidden_size), jnp.float32, -bound, bound)
    bv = jax.random.uniform(ks[5], (1, hidden_size), jnp.float32, -bound, bound)
    return wq, bq, wk, bk, wv, bv


def reference(x, wq, bq, wk, bk, wv, bv):
    """Pure-JAX reference mirroring the PyTorch forward (eval mode), full-f32."""
    hp = jax.lax.Precision.HIGHEST
    q = jnp.dot(x, wq, precision=hp) + bq
    k = jnp.dot(x, wk, precision=hp) + bk
    v = jnp.dot(x, wv, precision=hp) + bv
    scale = 1.0 / jnp.sqrt(jnp.float32(k.shape[-1]))
    scores = jnp.einsum("btd,bsd->bts", q, k, precision=hp) * scale
    T = x.shape[1]
    m = jnp.tril(jnp.ones((T, T), dtype=bool))
    scores = jnp.where(m[None], scores, -jnp.inf)
    attn = jax.nn.softmax(scores, axis=-1)
    out = jnp.einsum("bts,bsd->btd", attn, v, precision=hp)
    return out, attn[-1]


if __name__ == "__main__":
    B, T, E, H = 2, 8, 32, 32  # batch, seq_len, embed_size, hidden_size

    key = jax.random.PRNGKey(0)
    kx, kp = jax.random.split(key)
    x = jax.random.normal(kx, (B, T, E), dtype=jnp.float32)
    params = init_params(kp, E, H)

    ref_out, ref_attn = reference(x, *params)

    # f32 compute path: tight check against the reference.
    out32, attn32 = head_attention(x, *params, compute_dtype=jnp.float32)
    out32 = jax.block_until_ready(out32)
    attn32 = jax.block_until_ready(attn32)
    assert out32.shape == (B, T, H)
    assert attn32.shape == (T, T)
    assert jnp.allclose(out32, ref_out, atol=1e-4, rtol=1e-4)
    assert jnp.allclose(attn32, ref_attn, atol=1e-4, rtol=1e-4)

    # bf16 MXU-input path (default, performance mode): relaxed tolerance.
    out_bf, attn_bf = head_attention(x, *params)  # compute_dtype=bf16
    out_bf = jax.block_until_ready(out_bf)
    attn_bf = jax.block_until_ready(attn_bf)
    assert out_bf.shape == (B, T, H)
    assert attn_bf.shape == (T, T)
    assert jnp.allclose(out_bf, ref_out, atol=5e-2, rtol=5e-2)
    assert jnp.allclose(attn_bf, ref_attn, atol=5e-2, rtol=5e-2)

    print("KERNEL_OK")
</pallas_src>

<mosaic_0001>
module attributes {stable_mosaic.version = 11 : i64} {
  func.func @head_attention_kernel(%arg0: i32, %arg1: memref<16x32xf32, #tpu.memory_space<vmem>>, %arg2: memref<32x384xf32, #tpu.memory_space<vmem>>, %arg3: memref<1x384xf32, #tpu.memory_space<vmem>>, %arg4: memref<8x8xf32, #tpu.memory_space<vmem>>, %arg5: memref<16x128xf32, #tpu.memory_space<vmem>>, %arg6: memref<1x8x8xf32, #tpu.memory_space<vmem>>) attributes {dimension_semantics = [#tpu.dimension_semantics<parallel>], iteration_bounds = array<i64: 1>, scalar_prefetch = 0 : i64, scratch_operands = 0 : i64, tpu.core_type = #tpu.core_type<tc>, window_params = [{transform_indices = @transform_0, window_bounds = array<i64: 16, 32>}, {pipeline_mode = #tpu.pipeline_mode<synchronous>, transform_indices = @transform_1, window_bounds = array<i64: 32, 384>}, {pipeline_mode = #tpu.pipeline_mode<synchronous>, transform_indices = @transform_2, window_bounds = array<i64: 1, 384>}, {pipeline_mode = #tpu.pipeline_mode<synchronous>, transform_indices = @transform_3, window_bounds = array<i64: 8, 8>}, {transform_indices = @transform_4, window_bounds = array<i64: 16, 128>}, {transform_indices = @transform_5, window_bounds = array<i64: 1, 8, 8>}]} {
    %c0 = arith.constant 0 : index
    %c0_0 = arith.constant 0 : index
    %0 = vector.load %arg1[%c0, %c0_0] : memref<16x32xf32, #tpu.memory_space<vmem>>, vector<16x32xf32>
    %c0_1 = arith.constant 0 : index
    %c0_2 = arith.constant 0 : index
    %1 = vector.load %arg2[%c0_1, %c0_2] : memref<32x384xf32, #tpu.memory_space<vmem>>, vector<32x384xf32>
    %cst = arith.constant dense<0.000000e+00> : vector<16x384xf32>
    %2 = tpu.matmul %0, %1, %cst {dimension_numbers = #tpu.dot_dimension_numbers<[1], [0], [0], [1], [0, 0, 1, 1], [], []>} : vector<16x32xf32>, vector<32x384xf32>, vector<16x384xf32> -> vector<16x384xf32>
    %c0_3 = arith.constant 0 : index
    %c0_4 = arith.constant 0 : index
    %3 = vector.load %arg3[%c0_3, %c0_4] : memref<1x384xf32, #tpu.memory_space<vmem>>, vector<1x384xf32>
    %4 = vector.broadcast %3 : vector<1x384xf32> to vector<16x384xf32>
    %5 = arith.addf %2, %4 : vector<16x384xf32>
    %6 = vector.extract_strided_slice %5 {offsets = [0, 0], sizes = [16, 128], strides = [1, 1]} : vector<16x384xf32> to vector<16x128xf32>
    %7 = vector.extract_strided_slice %5 {offsets = [0, 128], sizes = [16, 128], strides = [1, 1]} : vector<16x384xf32> to vector<16x128xf32>
    %8 = vector.extract_strided_slice %5 {offsets = [0, 256], sizes = [16, 128], strides = [1, 1]} : vector<16x384xf32> to vector<16x128xf32>
    %9 = vector.shape_cast %6 : vector<16x128xf32> to vector<2x8x128xf32>
    %10 = vector.shape_cast %7 : vector<16x128xf32> to vector<2x8x128xf32>
    %11 = vector.shape_cast %8 : vector<16x128xf32> to vector<2x8x128xf32>
    "tpu.trace_start"() <{level = 10 : i32, message = "bqd,bkd->bqk"}> : () -> ()
    %cst_5 = arith.constant dense<0.000000e+00> : vector<2x8x8xf32>
    %12 = tpu.matmul %9, %10, %cst_5 {dimension_numbers = #tpu.dot_dimension_numbers<[2], [2], [1], [1], [0, 0, 0, 1, 1, 1], [0], [0]>} : vector<2x8x128xf32>, vector<2x8x128xf32>, vector<2x8x8xf32> -> vector<2x8x8xf32>
    "tpu.trace_stop"() : () -> ()
    %c0_6 = arith.constant 0 : index
    %c0_7 = arith.constant 0 : index
    %13 = vector.load %arg4[%c0_6, %c0_7] : memref<8x8xf32, #tpu.memory_space<vmem>>, vector<8x8xf32>
    %14 = vector.shape_cast %13 : vector<8x8xf32> to vector<1x8x8xf32>
    %15 = vector.broadcast %14 : vector<1x8x8xf32> to vector<2x8x8xf32>
    %16 = arith.addf %12, %15 : vector<2x8x8xf32>
    %cst_8 = arith.constant dense<0xFF800000> : vector<2x8xf32>
    %17 = vector.multi_reduction <maximumf>, %16, %cst_8 [2] : vector<2x8x8xf32> to vector<2x8xf32>
    %18 = vector.shape_cast %17 : vector<2x8xf32> to vector<2x8x1xf32>
    %19 = vector.broadcast %18 : vector<2x8x1xf32> to vector<2x8x8xf32>
    %20 = arith.subf %16, %19 : vector<2x8x8xf32>
    %21 = math.exp %20 : vector<2x8x8xf32>
    %cst_9 = arith.constant dense<0.000000e+00> : vector<2x8xf32>
    %22 = vector.multi_reduction <add>, %21, %cst_9 [2] : vector<2x8x8xf32> to vector<2x8xf32>
    %23 = vector.shape_cast %22 : vector<2x8xf32> to vector<2x8x1xf32>
    %24 = tpu.reciprocal %23 {approx = true} : vector<2x8x1xf32> -> vector<2x8x1xf32>
    %25 = arith.mulf %23, %24 : vector<2x8x1xf32>
    %cst_10 = arith.constant 2.000000e+00 : f32
    %26 = vector.broadcast %cst_10 : f32 to vector<2x8x1xf32>
    %27 = arith.subf %26, %25 : vector<2x8x1xf32>
    %28 = arith.mulf %24, %27 : vector<2x8x1xf32>
    %29 = vector.broadcast %28 : vector<2x8x1xf32> to vector<2x8x8xf32>
    %30 = arith.mulf %21, %29 : vector<2x8x8xf32>
    "tpu.trace_start"() <{level = 10 : i32, message = "bqk,bkd->bqd"}> : () -> ()
    %cst_11 = arith.constant dense<0.000000e+00> : vector<2x8x128xf32>
    %31 = tpu.matmul %30, %11, %cst_11 {dimension_numbers = #tpu.dot_dimension_numbers<[2], [1], [1], [2], [0, 0, 0, 1, 1, 2], [0], [0]>} : vector<2x8x8xf32>, vector<2x8x128xf32>, vector<2x8x128xf32> -> vector<2x8x128xf32>
    "tpu.trace_stop"() : () -> ()
    %32 = vector.shape_cast %31 : vector<2x8x128xf32> to vector<16x128xf32>
    %c0_12 = arith.constant 0 : index
    %c0_13 = arith.constant 0 : index
    %33 = vector.load %arg5[%c0_12, %c0_13] : memref<16x128xf32, #tpu.memory_space<vmem>>, vector<16x128xf32>
    tpu.vector_store %arg5[%c0_12, %c0_13], %32 {strides = array<i32>} : memref<16x128xf32, #tpu.memory_space<vmem>>, vector<16x128xf32>,
    %34 = vector.extract_strided_slice %30 {offsets = [1, 0, 0], sizes = [1, 8, 8], strides = [1, 1, 1]} : vector<2x8x8xf32> to vector<1x8x8xf32>
    %35 = vector.shape_cast %34 : vector<1x8x8xf32> to vector<8x8xf32>
    %36 = vector.shape_cast %35 : vector<8x8xf32> to vector<1x8x8xf32>
    %c0_14 = arith.constant 0 : index
    %c0_15 = arith.constant 0 : index
    %c0_16 = arith.constant 0 : index
    %37 = vector.load %arg6[%c0_14, %c0_15, %c0_16] : memref<1x8x8xf32, #tpu.memory_space<vmem>>, vector<1x8x8xf32>
    tpu.vector_store %arg6[%c0_14, %c0_15, %c0_16], %36 {strides = array<i32>} : memref<1x8x8xf32, #tpu.memory_space<vmem>>, vector<1x8x8xf32>,
    return
  }
  func.func @transform_0(%arg0: i32) -> (i32, i32) {
    %c0_i32 = arith.constant 0 : i32
    %c0_i32_0 = arith.constant 0 : i32
    return %arg0, %c0_i32 : i32, i32
  }
  func.func @transform_1(%arg0: i32) -> (i32, i32) {
    %c0_i32 = arith.constant 0 : i32
    %c0_i32_0 = arith.constant 0 : i32
    %c0_i32_1 = arith.constant 0 : i32
    return %c0_i32, %c0_i32_0 : i32, i32
  }
  func.func @transform_2(%arg0: i32) -> (i32, i32) {
    %c0_i32 = arith.constant 0 : i32
    %c0_i32_0 = arith.constant 0 : i32
    %c0_i32_1 = arith.constant 0 : i32
    return %c0_i32, %c0_i32_0 : i32, i32
  }
  func.func @transform_3(%arg0: i32) -> (i32, i32) {
    %c0_i32 = arith.constant 0 : i32
    %c0_i32_0 = arith.constant 0 : i32
    %c0_i32_1 = arith.constant 0 : i32
    return %c0_i32, %c0_i32_0 : i32, i32
  }
  func.func @transform_4(%arg0: i32) -> (i32, i32) {
    %c0_i32 = arith.constant 0 : i32
    %c0_i32_0 = arith.constant 0 : i32
    return %arg0, %c0_i32 : i32, i32
  }
  func.func @transform_5(%arg0: i32) -> (i32, i32, i32) {
    %c0_i32 = arith.constant 0 : i32
    %c0_i32_0 = arith.constant 0 : i32
    %c0_i32_1 = arith.constant 0 : i32
    return %arg0, %c0_i32, %c0_i32_0 : i32, i32, i32
  }
}

</mosaic_0001>

<bundles_post_ra>
// kernel: tpu_custom_call.1
= control target key start
LH: loop header
LB: loop body
LE: loop exit
PB: predicated region body
PF: predicated region fallthrough
CT: control target
= control target key end

     0   :  { %11 = vsyncpa [#allocation3], 0  ;;  %s896_s0 = inlined_call_operand.hbm [shape: f32[16,32], index: 0, kind: input, shape index: {}]   ;;  %s897_s1 = inlined_call_operand.hbm [shape: f32[32,384], index: 1, kind: input, shape index: {}]   ;;  %s898_s2 = inlined_call_operand.vmem [shape: f32[1,384], index: 2, kind: input, shape index: {}]   ;;  %s899_s3 = inlined_call_operand.vmem [shape: f32[8,8], index: 3, kind: input, shape index: {}]   ;;  %s900_s4 = inlined_call_operand.hbm [shape: f32[16,128], index: 4, kind: output, shape index: {0}]   ;;  %s901_s5 = inlined_call_operand.hbm [shape: f32[1,8,8], index: 5, kind: output, shape index: {1}]  }
   0x1   :  { %12 = vsyncpa [#allocation6], 0 }
   0x2   :  { %13 = vsyncpa [#allocation4], 0 }
   0x3   :  { %14 = vsyncpa [#allocation9], 0  ;;  %s771_s18 = smov [#allocation2]   ;;  %s675_s22 = scalar_lea.hbm %s896_s0, 256 }
   0x4   :  { %s20_s19 = sshll.u32 %s771_s18, 4  ;;  %p676_p0 = scmp.ne.s32.totalorder %s896_s0, %s675_s22  ;;  %s21_s19 = int_to_ptr.vmem [resolvable:$true] %s20_s19 }
   0x5   :  { %p679_p1 = scmp.lt.u32.totalorder %s675_s22, %s896_s0 }
   0x7   :  { %p681_p2 = pnand %p679_p1, %p676_p0 }
   0x9   :  { %684 = shalt.err (!%p681_p2)
}
   0xa   :  { %s685_s27 = scalar_lea.vmem %s21_s19, 256  ;;  %p690_p4 = scmp.lt.s32.totalorder %s21_s19, %s21_s19 }
   0xb   :  { %p686_p3 = scmp.ne.s32.totalorder %s21_s19, %s685_s27  ;;  %p691_p5 = scmp.lt.s32.totalorder %s685_s27, %s685_s27 }
   0xd   :  { %p692_p6 = por %p691_p5, %p690_p4 }
   0xf   :  { %p693_p7 = pnand %p692_p6, %p686_p3 }
  0x11   :  { %696 = shalt.err (!%p693_p7)
}
  0x12   :  { %s772_s28 = smov 128   ;;  %s773_s29 = smov 8  }
  0x13   :  { %26 = dma.hbm_to_vmem [thread:$0]  %s896_s0, 256, %s21_s19, [#allocation3], %s772_s28, %s772_s28, %s773_s29  }
  0x14   :  { %s774_s7 = smov [#allocation5]   ;;  %s697_s11 = scalar_lea.hbm %s897_s1, 1536 }
  0x15   :  { %s32_s8 = sshll.u32 %s774_s7, 4  ;;  %p698_p8 = scmp.ne.s32.totalorder %s897_s1, %s697_s11  ;;  %s33_s8 = int_to_ptr.vmem [resolvable:$true] %s32_s8 }
  0x16   :  { %p701_p9 = scmp.lt.u32.totalorder %s697_s11, %s897_s1 }
  0x18   :  { %p703_p10 = pnand %p701_p9, %p698_p8 }
  0x1a   :  { %706 = shalt.err (!%p703_p10)
}
  0x1b   :  { %s707_s16 = scalar_lea.vmem %s33_s8, 1536  ;;  %p712_p12 = scmp.lt.s32.totalorder %s33_s8, %s33_s8 }
  0x1c   :  { %p708_p11 = scmp.ne.s32.totalorder %s33_s8, %s707_s16  ;;  %p713_p13 = scmp.lt.s32.totalorder %s707_s16, %s707_s16 }
  0x1e   :  { %p714_p0 = por %p713_p13, %p712_p12 }
  0x20   :  { %p715_p1 = pnand %p714_p0, %p708_p11 }
  0x22   :  { %718 = shalt.err (!%p715_p1)
}
  0x23   :  { %s775_s0 = smov 384   ;;  %s776_s17 = smov 24  }
  0x24   :  { %38 = dma.hbm_to_vmem [thread:$0]  %s897_s1, 1536, %s33_s8, [#allocation6], %s775_s0, %s775_s0, %s776_s17  }
  0x25   :  { %763 = dma.done.wait [#allocation3], 256  }
  0x26   :  { %764 = vsyncadd [#allocation3], 4294967040 }
  0x27   :  { %765 = dma.done.wait [#allocation6], 1536  }
  0x28   :  { %766 = vsyncadd [#allocation6], 4294965760  ;;  %v777_v0 = vmov 0.0   ;;  %v52_v1 = vld [vmem:[#allocation5 + $0x8] sm:$0xff]  ;;  %v55_v2 = vld [vmem:[#allocation5 + $0x20] sm:$0xff]  ;;  %vm80_vm0 = vcmask 261120   ;;  %v65_v21 = vlaneseq }
  0x29   :  { %151 = vmatprep.mubr.f32.mxu0 %v777_v0  ;;  %v51_v3 = vld [vmem:[#allocation5] sm:$0xff]  ;;  %v641_v4 = vpack.c.bf16 %v55_v2, %v52_v1  ;;  %v54_v5 = vld [vmem:[#allocation5 + $0x18] sm:$0xff]  ;;  %v61_v7 = vld [vmem:[#allocation5 + $0x50] sm:$0xff]  ;;  %vm778_vm1 = vmmov 0   ;;  %vm380_vm2 = vcmask 64512  }
  0x2a   :  { %v58_v6 = vld [vmem:[#allocation5 + $0x38] sm:$0xff]  ;;  %v643_v8 = vpack.c.bf16 %v54_v5, %v51_v3  ;;  %v57_v10 = vld [vmem:[#allocation5 + $0x30] sm:$0xff]  ;;  %v60_v11 = vld [vmem:[#allocation5 + $0x48] sm:$0xff]  ;;  %v66_v22 = vshrl.u32 %v65_v21, 7 }
  0x2b   :  { %v645_v9 = vpack.c.bf16 %v61_v7, %v58_v6  ;;  %v49_v12 = vld [vmem:[#allocation2] sm:$0xff]  ;;  %642 = vmatprep.subr.bf16.mxu0 %v641_v4  ;;  %v56_v14 = vld [vmem:[#allocation5 + $0x28] sm:$0xff]  ;;  %v647_v15 = vpack.c.bf16 %v60_v11, %v57_v10  ;;  %v59_v17 = vld [vmem:[#allocation5 + $0x40] sm:$0xff] }
  0x2c   :  { %v53_v13 = vld [vmem:[#allocation5 + $0x10] sm:$0xff]  ;;  %618 = vmatprep.mubr.msk.f32.mxu1 %vm80_vm0, %v49_v12  ;;  %644 = vmatpush1.bf16.msra.mxu0 %v643_v8  ;;  %v62_v18 = vld [vmem:[#allocation5 + $0x58] sm:$0xff]  ;;  %v71_v23 = vsub.s32 1, %v66_v22  ;;  %v67_v25 = vsub.s32 0, %v66_v22  ;;  %v75_v26 = vsub.s32 2, %v66_v22 }
  0x2d   :  { %v649_v16 = vpack.c.bf16 %v56_v14, %v53_v13  ;;  %646 = vmatprep.subr.bf16.mxu0 %v645_v9  ;;  %v653_v19 = vpack.c.bf16 %v62_v18, %v59_v17  ;;  %v50_v20 = vld [vmem:[#allocation2 + $0x8] sm:$0xff]  ;;  %v63_v24 = vld [vmem:[%s898_s2] sm:$0x7] }
  0x2e   :  { %v72_v27 = vrot.slane %v63_v24, %v71_v23  ;;  %v68_v29 = vrot.slane %v63_v24, %v67_v25  ;;  %v76_v31 = vrot.slane %v63_v24, %v75_v26  ;;  %v239_v42 = vld [vmem:[%s899_s3] sm:$0xff]  ;;  %s779_s3 = smov [#allocation8]  }
  0x2f   :  { %650 = vmatprep.subr.bf16.mxu1 %v649_v16  ;;  %s576_s22 = sshll.u32 %s779_s3, 4  ;;  %s577_s22 = int_to_ptr.vmem [resolvable:$true] %s576_s22 }
  0x30   :  { %652 = vmatpush3.bf16.msra.mxu1 %v649_v16  ;;  %648 = vmatpush1.bf16.msra.mxu0 %v647_v15  ;;  %s719_s23 = scalar_lea.vmem %s577_s22, 128  ;;  %p724_p3 = scmp.lt.s32.totalorder %s577_s22, %s577_s22 }
  0x31   :  { %654 = vmatprep.subr.bf16.mxu1 %v653_v19  ;;  %626 = vmatprep.subr.mxu0 %v777_v0  ;;  %p720_p2 = scmp.ne.s32.totalorder %s577_s22, %s719_s23  ;;  %p725_p4 = scmp.lt.s32.totalorder %s719_s23, %s719_s23 }
  0x33   :  { %590 = vmatmul.mubr.msk.f32.vlgmr.msra.gmra.mrb[0].mxu0 %vm80_vm0, %v49_v12  ;;  %p726_p5 = por %p725_p4, %p724_p3 }
  0x34   :  { %656 = vmatpush3.bf16.msra.mxu1 %v653_v19  ;;  %157 = vmatprep.mubr.f32.mxu0 %v777_v0 }
  0x35   :  { %621 = vmatprep.subr.mxu1 %v777_v0  ;;  %p727_p6 = pnand %p726_p5, %p720_p2 }
  0x37   :  { %619 = vmatmul.mubr.msk.f32.vlgmr.msra.gmra.mrb[0].mxu1 %vm80_vm0, %v50_v20  ;;  %591 = vmatmul.mubr.msk.f32.gmra.mrb[2].mxu0 %vm80_vm0, %v50_v20 }
  0x38   :  { %623 = vmatprep.mubr.msk.f32.mxu1 %vm778_vm1, %v777_v0  ;;  %628 = vmatprep.mubr.msk.f32.mxu0 %vm778_vm1, %v777_v0 }
 0x106   :  { %v153_v28 = vpop.f32.mrb[0].mxu0 }
 0x107   :  { %v155_v30 = vpop.f32.mrb[1].mxu0  ;;  %v154_v36 = vadd.f32 %v153_v28, %v68_v29 }
 0x108   :  { %v156_v32 = vadd.f32 %v155_v30, %v72_v27 }
 0x10a   :  { %v620_v33 = vpop.f32.mrb[0].mxu1  ;;  %v159_v34 = vpop.f32.mrb[2].mxu0  ;;  %622 = vmatpush3.xpose.msra.mxu1 %v156_v32 }
 0x10b   :  { %v230_v35 = vpop.f32.mrb[1].mxu1  ;;  %v161_v37 = vpop.f32.mrb[3].mxu0  ;;  %631 = vmatprep.subr.mxu1 %v777_v0  ;;  %v236_v40 = vadd.f32 %v620_v33, %v76_v31  ;;  %v160_v41 = vadd.f32 %v159_v34, %v68_v29 }
 0x10c   :  { %v231_v38 = vadd.f32 %v230_v35, %v76_v31  ;;  %v162_v39 = vadd.f32 %v161_v37, %v72_v27 }
 0x10d   :  { %624 = vmatmul.mubr.f32.vlgmr.msra.gmra.mrb[2].mxu1 %v154_v36 }
 0x10e   :  { %627 = vmatpush3.xpose.msra.mxu0 %v162_v39  ;;  %632 = vmatpush3.msra.mxu1 %v231_v38 }
 0x10f   :  { %636 = vmatprep.subr.mxu0 %v777_v0  ;;  %633 = vmatprep.mubr.msk.f32.mxu1 %vm778_vm1, %v777_v0 }
 0x111   :  { %629 = vmatmul.mubr.f32.vlgmr.msra.gmra.mrb[4].mxu0 %v160_v41 }
 0x112   :  { %637 = vmatpush3.msra.mxu0 %v236_v40  ;;  %638 = vmatprep.mubr.msk.f32.mxu0 %vm778_vm1, %v777_v0 }
 0x1e0   :  { %v306_v43 = vpop.f32.mrb[2].mxu1 }
 0x1e1   :  { %v307_v44 = vadd.f32 %v306_v43, %v239_v42  ;;  %v625_v45 = vpop.f32.mrb[3].mxu1 }
 0x1e3   :  { %v381_v46 = vsel %vm380_vm2, %v307_v44, -inf }
 0x1e4   :  { %v376_v47 = vpop.f32.mrb[4].mxu0  ;;  %382 = vmax.xlane.f32.xlu0 %v381_v46 }
 0x1e5   :  { %v377_v48 = vadd.f32 %v376_v47, %v239_v42  ;;  %v630_v49 = vpop.f32.mrb[5].mxu0 }
 0x1e7   :  { %v384_v50 = vsel %vm380_vm2, %v377_v48, -inf }
 0x1e8   :  { %385 = vmax.xlane.f32.xlu0 %v384_v50 }
 0x271   :  { %v383_v51 = vpop.xlane.xlu0 %382 }
 0x272   :  { %v387_v52 = vsub.f32 %v307_v44, %v383_v51 }
 0x274   :  { %v389_v53 = vmul.f32 1.442695, %v387_v52 }
 0x275   :  { %v386_v54 = vpop.xlane.xlu0 %385 }
 0x276   :  { %667 = vpow2.f32 %v389_v53  ;;  %v388_v55 = vsub.f32 %v377_v48, %v386_v54 }
 0x278   :  { %v391_v56 = vmul.f32 1.442695, %v388_v55 }
 0x27a   :  { %669 = vpow2.f32 %v391_v56 }
 0x280   :  { %v668_v57 = vpop.eup %667 }
 0x281   :  { %v393_v58 = vsel %vm380_vm2, %v668_v57, 0.0 }
 0x282   :  { %394 = vadd.xlane.f32.xlu1 %v393_v58 }
 0x284   :  { %v670_v59 = vpop.eup %669 }
 0x285   :  { %v396_v60 = vsel %vm380_vm2, %v670_v59, 0.0 }
 0x286   :  { %397 = vadd.xlane.f32.xlu1 %v396_v60 }
 0x30f   :  { %v395_v61 = vpop.xlane.xlu1 %394 }
 0x310   :  { %671 = vrcp.f32 %v395_v61 }
 0x313   :  { %v398_v62 = vpop.xlane.xlu1 %397 }
 0x314   :  { %673 = vrcp.f32 %v398_v62 }
 0x31a   :  { %v672_v63 = vpop.eup %671 }
 0x31b   :  { %v401_v0 = vmul.f32 %v672_v63, %v395_v61 }
 0x31d   :  { %v403_v1 = vsub.f32 2.0, %v401_v0 }
 0x31e   :  { %v674_v2 = vpop.eup %673 }
 0x31f   :  { %v405_v3 = vmul.f32 %v672_v63, %v403_v1  ;;  %v402_v4 = vmul.f32 %v674_v2, %v398_v62 }
 0x321   :  { %v407_v5 = vmul.f32 %v668_v57, %v405_v3  ;;  %v404_v6 = vsub.f32 2.0, %v402_v4 }
 0x323   :  { %v406_v7 = vmul.f32 %v674_v2, %v404_v6  ;;  %634 = vmatmul.mubr.msk.f32.vlgmr.msra.gmra.mrb[4].mxu1 %vm380_vm2, %v407_v5 }
 0x325   :  { %v408_v8 = vmul.f32 %v670_v59, %v406_v7 }
 0x327   :  { %557 = vst.msk [vmem:[#allocation8] sm:$0xff] %vm380_vm2, %v408_v8  ;;  %639 = vmatmul.mubr.msk.f32.vlgmr.msra.gmra.mrb[6].mxu0 %vm380_vm2, %v408_v8 }
 0x328   :  { %730 = shalt.err (!%p727_p6)
}
 0x329   :  { %s731_s26 = scalar_lea.hbm %s901_s5, 128 }
 0x32a   :  { %p732_p7 = scmp.ne.s32.totalorder %s901_s5, %s731_s26  ;;  %p735_p8 = scmp.lt.u32.totalorder %s731_s26, %s901_s5 }
 0x32c   :  { %p737_p9 = pnand %p735_p8, %p732_p7 }
 0x32e   :  { %740 = shalt.err (!%p737_p9)
}
 0x32f   :  { %579 = dma.vmem_to_hbm [thread:$0]  %s577_s22, 128, %s901_s5, [#allocation9]  }
 0x330   :  { %s780_s10 = smov [#allocation7]  }
 0x331   :  { %s563_s11 = sshll.u32 %s780_s10, 4  ;;  %s564_s11 = int_to_ptr.vmem [resolvable:$true] %s563_s11 }
 0x332   :  { %s741_s12 = scalar_lea.vmem %s564_s11, 256  ;;  %p746_p11 = scmp.lt.s32.totalorder %s564_s11, %s564_s11 }
 0x333   :  { %p742_p10 = scmp.ne.s32.totalorder %s564_s11, %s741_s12  ;;  %p747_p12 = scmp.lt.s32.totalorder %s741_s12, %s741_s12 }
 0x335   :  { %p748_p13 = por %p747_p12, %p746_p11 }
 0x337   :  { %p749_p0 = pnand %p748_p13, %p742_p10 }
 0x3f6   :  { %v478_v9 = vpop.f32.mrb[4].mxu1 }
 0x3f7   :  { %555 = vst [vmem:[#allocation7] sm:$0xff] %v478_v9  ;;  %v635_v10 = vpop.f32.mrb[5].mxu1 }
 0x3fa   :  { %v551_v11 = vpop.f32.mrb[6].mxu0 }
 0x3fb   :  { %556 = vst [vmem:[#allocation7 + $0x8] sm:$0xff] %v551_v11  ;;  %v640_v12 = vpop.f32.mrb[7].mxu0 }
 0x3fc   :  { %752 = shalt.err (!%p749_p0)
}
 0x3fd   :  { %s753_s5 = scalar_lea.hbm %s900_s4, 256 }
 0x3fe   :  { %p754_p1 = scmp.ne.s32.totalorder %s900_s4, %s753_s5  ;;  %p757_p2 = scmp.lt.u32.totalorder %s753_s5, %s900_s4 }
 0x400   :  { %p759_p3 = pnand %p757_p2, %p754_p1 }
 0x402   :  { %762 = shalt.err (!%p759_p3)
}
 0x403   :  { %569 = dma.vmem_to_hbm [thread:$0]  %s564_s11, 256, %s900_s4, [#allocation4], %s772_s28, %s772_s28, %s773_s29  }
 0x404   :  { %767 = dma.done.wait [#allocation4], 256  }
 0x405   :  { %768 = vsyncadd [#allocation4], 4294967040 }
 0x406   :  { %769 = dma.done.wait [#allocation9], 128  }
 0x407   :  { %770 = vsyncadd [#allocation9], 4294967168 }
 0x408   :  { %586 = vsyncpa [#allocation3], 1 }
 0x409   :  { %587 = vsyncpa [#allocation6], 1 }
 0x40a   :  { %588 = vsyncpa [#allocation4], 1 }
 0x40b   :  { %589 = vsyncpa [#allocation9], 1 }

</bundles_post_ra>
